<compile_context>
chip_gen: v7x
topology: tpu7x:2x2x1
jax: 0.10.0
libtpu: 0.0.40
codegen_flags: <defaults>
</compile_context>

<pallas_src>
import functools

import jax
import jax.numpy as jnp
from jax import lax
from jax.experimental import pallas as pl
from jax.experimental.pallas import tpu as pltpu


# --------------------------------------------------------------------------
# Fused forward kernel (one grid step == NB images)
# --------------------------------------------------------------------------
def _make_fused_kernel(H, W, NB):
    """Channel-major (C, NB*H*W) layout; lane index = b*H*W + i*W + j.

    VALID convs are evaluated on the full H*W grid via static lane rolls; the
    wrap-around columns are provably only read for output columns we discard.
    """
    HW = H * W
    L = NB * HW
    K1, K2, K4 = 2, 2, 3
    H4, W4 = H - 4, W - 4

    def shl(v, s):
        # result[..., p] = v[..., (p + s) % L]  -- static lane roll on the XLU.
        if s % L == 0:
            return v
        return pltpu.roll(v, (-s) % L, axis=1)

    def kernel(x_ref, w1_ref, b1_ref, w23_ref, b23_ref, w4_ref, b4_ref, o_ref):
        x_flat = x_ref[0]                                        # (1, L)

        # ---------------- conv1: 1 -> 16, k=2 (4 broadcast FMAs, VPU) ---------
        acc1 = None
        for di in range(K1):
            for dj in range(K1):
                t = di * K1 + dj
                term = w1_ref[:, t:t + 1] * shl(x_flat, di * W + dj)  # (16, L)
                acc1 = term if acc1 is None else acc1 + term
        a1 = acc1 + b1_ref[...]                                  # (16, L), no ReLU

        # ------ conv2 & conv3 (concat fused on Cout): ONE (64,64)x(64,L) GEMM --
        rhs23 = jnp.concatenate(
            [shl(a1, di * W + dj) for di in range(K2) for dj in range(K2)],
            axis=0)                                              # (64, L)
        y23 = jnp.dot(w23_ref[...], rhs23, preferred_element_type=jnp.float32)
        a2 = jnp.maximum(y23 + b23_ref[...], 0.0)                # ReLU(cat), (64, L)

        # ---------------- conv4: 64 -> 16, k=3 (3 GEMMs, K=192, MXU) ----------
        acc4 = None
        for di in range(K4):
            rhs = jnp.concatenate([shl(a2, di * W + dj) for dj in range(K4)],
                                  axis=0)                        # (192, L)
            part = jnp.dot(w4_ref[:, di * 192:(di + 1) * 192], rhs,
                           preferred_element_type=jnp.float32)   # (16, L)
            acc4 = part if acc4 is None else acc4 + part
        y4 = acc4 + b4_ref[...]                                  # (16, L), no ReLU

        # Lane-dense store of the full H*W slab per image; the wrapper slices
        # the valid (H-4, W-4) window (no narrow masked compaction stores here).
        for b in range(NB):
            o_ref[b] = y4[:, b * HW:(b + 1) * HW]

    return kernel, (H4, W4)


def _pick_nb(n, hw):
    # Widen the GEMM lane dim with multiple images per step, but (a) keep >=2
    # grid steps when N >= 2 (v7x has 2 TensorCores) and (b) cap lane width
    # around 128 so all intermediates stay comfortably in vregs.
    cap = min(max(1, n // 2), max(1, 128 // hw))
    for nb in range(cap, 0, -1):
        if n % nb == 0:
            return nb
    return 1


def pruning_concat_forward(x, params, nb=None):
    """x: (N, 1, H, W) NCHW -> (N, 16, H-4, W-4) NCHW (matches the PyTorch module)."""
    N, cin, H, W = x.shape
    assert cin == 1
    HW = H * W
    NB = _pick_nb(N, HW) if nb is None else nb
    assert N % NB == 0
    L = NB * HW
    kernel, (H4, W4) = _make_fused_kernel(H, W, NB)

    # Weight matrices in (Cout, tap*Cin + cin) GEMM layout, tap = di*k + dj.
    w1m = params["w1"].transpose(0, 2, 3, 1).reshape(16, 4)
    w2m = params["w2"].transpose(0, 2, 3, 1).reshape(32, 4 * 16)
    w3m = params["w3"].transpose(0, 2, 3, 1).reshape(32, 4 * 16)
    w23m = jnp.concatenate([w2m, w3m], axis=0)                   # (64, 64): cat on Cout is free
    b23 = jnp.concatenate([params["b2"], params["b3"]], axis=0)  # (64,)
    w4m = params["w4"].transpose(0, 2, 3, 1).reshape(16, 9 * 64) # (16, 576)

    # Images of one grid step laid out contiguously along the lane axis.
    x_flat = x.reshape(N // NB, 1, L)

    out = pl.pallas_call(
        kernel,
        out_shape=jax.ShapeDtypeStruct((N, 16, HW), jnp.float32),
        grid=(N // NB,),
        in_specs=[
            pl.BlockSpec((1, 1, L), lambda n: (n, 0, 0)),        # NB images per step
            pl.BlockSpec((16, 4), lambda n: (0, 0)),             # conv1 weights
            pl.BlockSpec((16, 1), lambda n: (0, 0)),             # conv1 bias
            pl.BlockSpec((64, 64), lambda n: (0, 0)),            # conv2|conv3 weights
            pl.BlockSpec((64, 1), lambda n: (0, 0)),             # conv2|conv3 bias
            pl.BlockSpec((16, 9 * 64), lambda n: (0, 0)),        # conv4 weights
            pl.BlockSpec((16, 1), lambda n: (0, 0)),             # conv4 bias
        ],
        out_specs=pl.BlockSpec((NB, 16, HW), lambda n: (n, 0, 0)),
        compiler_params=pltpu.CompilerParams(
            dimension_semantics=("parallel",)),                  # batch steps -> 2 TCs on v7x
    )(x_flat, w1m, params["b1"].reshape(16, 1), w23m, b23.reshape(64, 1),
      w4m, params["b4"].reshape(16, 1))

    # (N, 16, H*W) -> NCHW + VALID window: pure reshape + static slice, no transpose.
    return out.reshape(N, 16, H, W)[:, :, :H4, :W4]


# --------------------------------------------------------------------------
# Deterministic parameters (replicating create_conv / fill_conv_weight / fill_bias)
# --------------------------------------------------------------------------
def _create_conv_params(cin, cout, k, w_fill, b_fill):
    w = jnp.full((cout, cin, k, k), float(w_fill), jnp.float32)
    w = w + jnp.eye(k, dtype=jnp.float32)            # fill_conv_weight adds eye(k)
    b = jnp.full((cout,), float(b_fill), jnp.float32)
    return w, b


def make_params():
    p = {}
    # conv1 = create_conv(1, 16, 2, 1, -2); weight[i] += i
    w1, b1 = _create_conv_params(1, 16, 2, 1.0, -2.0)
    p["w1"] = w1 + jnp.arange(16, dtype=jnp.float32)[:, None, None, None]
    p["b1"] = b1
    # conv2 / conv3 = create_conv(16, 32, 2, 2, -2); weight[i] += i
    inc32 = jnp.arange(32, dtype=jnp.float32)[:, None, None, None]
    w2, b2 = _create_conv_params(16, 32, 2, 2.0, -2.0)
    w3, b3 = _create_conv_params(16, 32, 2, 2.0, -2.0)
    p["w2"], p["b2"] = w2 + inc32, b2
    p["w3"], p["b3"] = w3 + inc32, b3
    # conv4 = create_conv(64, 16, 3, 10, 0); weight[i] += i
    w4, b4 = _create_conv_params(64, 16, 3, 10.0, 0.0)
    p["w4"] = w4 + jnp.arange(16, dtype=jnp.float32)[:, None, None, None]
    p["b4"] = b4
    return p


# --------------------------------------------------------------------------
# Plain-JAX reference (exact conv semantics of the PyTorch module)
# --------------------------------------------------------------------------
def reference_forward(x, p):
    dn = ("NCHW", "OIHW", "NCHW")
    conv = functools.partial(lax.conv_general_dilated, window_strides=(1, 1),
                             padding="VALID", dimension_numbers=dn,
                             precision=lax.Precision.HIGHEST)
    y1 = conv(x, p["w1"]) + p["b1"][None, :, None, None]
    y2 = conv(y1, p["w2"]) + p["b2"][None, :, None, None]
    y3 = conv(y1, p["w3"]) + p["b3"][None, :, None, None]
    ycat = jnp.maximum(jnp.concatenate([y2, y3], axis=1), 0.0)
    return conv(ycat, p["w4"]) + p["b4"][None, :, None, None]


if __name__ == "__main__":
    key = jax.random.PRNGKey(0)
    x = jax.random.normal(key, (2, 1, 8, 8), dtype=jnp.float32)     # NCHW, Cin=1
    params = make_params()

    fwd = jax.jit(lambda xx: pruning_concat_forward(xx, params))
    out = jax.block_until_ready(fwd(x))

    # 8 -> conv1(k2)=7 -> conv2/3(k2)=6 -> cat -> conv4(k3)=4
    assert out.shape == (2, 16, 4, 4), out.shape
    assert bool(jnp.all(jnp.isfinite(out)))

    # Check against the exact conv reference (scale-normalized max error, robust
    # to MXU f32 matmul rounding differences vs Precision.HIGHEST).
    ref = reference_forward(x, params)
    scale = jnp.maximum(jnp.max(jnp.abs(ref)), 1.0)
    err = jnp.max(jnp.abs(out - ref)) / scale
    assert bool(err < 2e-2), float(err)

    print("KERNEL_OK")
</pallas_src>

<mosaic_0001>
module attributes {stable_mosaic.version = 11 : i64} {
  func.func @kernel(%arg0: i32, %arg1: memref<1x1x64xf32, #tpu.memory_space<vmem>>, %arg2: memref<16x4xf32, #tpu.memory_space<vmem>>, %arg3: memref<16x1xf32, #tpu.memory_space<vmem>>, %arg4: memref<64x64xf32, #tpu.memory_space<vmem>>, %arg5: memref<64x1xf32, #tpu.memory_space<vmem>>, %arg6: memref<16x576xf32, #tpu.memory_space<vmem>>, %arg7: memref<16x1xf32, #tpu.memory_space<vmem>>, %arg8: memref<1x16x64xf32, #tpu.memory_space<vmem>>) attributes {dimension_semantics = [#tpu.dimension_semantics<parallel>], iteration_bounds = array<i64: 2>, scalar_prefetch = 0 : i64, scratch_operands = 0 : i64, tpu.core_type = #tpu.core_type<tc>, window_params = [{transform_indices = @transform_0, window_bounds = array<i64: 1, 1, 64>}, {pipeline_mode = #tpu.pipeline_mode<synchronous>, transform_indices = @transform_1, window_bounds = array<i64: 16, 4>}, {pipeline_mode = #tpu.pipeline_mode<synchronous>, transform_indices = @transform_2, window_bounds = array<i64: 16, 1>}, {pipeline_mode = #tpu.pipeline_mode<synchronous>, transform_indices = @transform_3, window_bounds = array<i64: 64, 64>}, {pipeline_mode = #tpu.pipeline_mode<synchronous>, transform_indices = @transform_4, window_bounds = array<i64: 64, 1>}, {pipeline_mode = #tpu.pipeline_mode<synchronous>, transform_indices = @transform_5, window_bounds = array<i64: 16, 576>}, {pipeline_mode = #tpu.pipeline_mode<synchronous>, transform_indices = @transform_6, window_bounds = array<i64: 16, 1>}, {transform_indices = @transform_7, window_bounds = array<i64: 1, 16, 64>}]} {
    %c0 = arith.constant 0 : index
    %c0_0 = arith.constant 0 : index
    %c0_1 = arith.constant 0 : index
    %0 = vector.load %arg1[%c0, %c0_0, %c0_1] : memref<1x1x64xf32, #tpu.memory_space<vmem>>, vector<1x1x64xf32>
    %1 = vector.shape_cast %0 : vector<1x1x64xf32> to vector<1x64xf32>
    %c0_2 = arith.constant 0 : index
    %c0_3 = arith.constant 0 : index
    %2 = vector.load %arg2[%c0_2, %c0_3] : memref<16x4xf32, #tpu.memory_space<vmem>>, vector<16x1xf32>
    %3 = vector.broadcast %2 : vector<16x1xf32> to vector<16x64xf32>
    %4 = vector.broadcast %1 : vector<1x64xf32> to vector<16x64xf32>
    %5 = arith.mulf %3, %4 : vector<16x64xf32>
    %c0_4 = arith.constant 0 : index
    %c1 = arith.constant 1 : index
    %6 = vector.load %arg2[%c0_4, %c1] : memref<16x4xf32, #tpu.memory_space<vmem>>, vector<16x1xf32>
    %c63_i32 = arith.constant 63 : i32
    %7 = tpu.dynamic_rotate %1 by %c63_i32 dim 1 : vector<1x64xf32>, i32 -> vector<1x64xf32>
    %8 = vector.broadcast %6 : vector<16x1xf32> to vector<16x64xf32>
    %9 = vector.broadcast %7 : vector<1x64xf32> to vector<16x64xf32>
    %10 = arith.mulf %8, %9 : vector<16x64xf32>
    %11 = arith.addf %5, %10 : vector<16x64xf32>
    %c0_5 = arith.constant 0 : index
    %c2 = arith.constant 2 : index
    %12 = vector.load %arg2[%c0_5, %c2] : memref<16x4xf32, #tpu.memory_space<vmem>>, vector<16x1xf32>
    %c56_i32 = arith.constant 56 : i32
    %13 = tpu.dynamic_rotate %1 by %c56_i32 dim 1 : vector<1x64xf32>, i32 -> vector<1x64xf32>
    %14 = vector.broadcast %12 : vector<16x1xf32> to vector<16x64xf32>
    %15 = vector.broadcast %13 : vector<1x64xf32> to vector<16x64xf32>
    %16 = arith.mulf %14, %15 : vector<16x64xf32>
    %17 = arith.addf %11, %16 : vector<16x64xf32>
    %c0_6 = arith.constant 0 : index
    %c3 = arith.constant 3 : index
    %18 = vector.load %arg2[%c0_6, %c3] : memref<16x4xf32, #tpu.memory_space<vmem>>, vector<16x1xf32>
    %c55_i32 = arith.constant 55 : i32
    %19 = tpu.dynamic_rotate %1 by %c55_i32 dim 1 : vector<1x64xf32>, i32 -> vector<1x64xf32>
    %20 = vector.broadcast %18 : vector<16x1xf32> to vector<16x64xf32>
    %21 = vector.broadcast %19 : vector<1x64xf32> to vector<16x64xf32>
    %22 = arith.mulf %20, %21 : vector<16x64xf32>
    %23 = arith.addf %17, %22 : vector<16x64xf32>
    %c0_7 = arith.constant 0 : index
    %c0_8 = arith.constant 0 : index
    %24 = vector.load %arg3[%c0_7, %c0_8] : memref<16x1xf32, #tpu.memory_space<vmem>>, vector<16x1xf32>
    %25 = vector.broadcast %24 : vector<16x1xf32> to vector<16x64xf32>
    %26 = arith.addf %23, %25 : vector<16x64xf32>
    %c63_i32_9 = arith.constant 63 : i32
    %27 = tpu.dynamic_rotate %26 by %c63_i32_9 dim 1 : vector<16x64xf32>, i32 -> vector<16x64xf32>
    %c56_i32_10 = arith.constant 56 : i32
    %28 = tpu.dynamic_rotate %26 by %c56_i32_10 dim 1 : vector<16x64xf32>, i32 -> vector<16x64xf32>
    %c55_i32_11 = arith.constant 55 : i32
    %29 = tpu.dynamic_rotate %26 by %c55_i32_11 dim 1 : vector<16x64xf32>, i32 -> vector<16x64xf32>
    %30 = tpu.concatenate %26, %27, %28, %29 in 0 : vector<16x64xf32>, vector<16x64xf32>, vector<16x64xf32>, vector<16x64xf32> -> vector<64x64xf32>
    %c0_12 = arith.constant 0 : index
    %c0_13 = arith.constant 0 : index
    %31 = vector.load %arg4[%c0_12, %c0_13] : memref<64x64xf32, #tpu.memory_space<vmem>>, vector<64x64xf32>
    %cst = arith.constant dense<0.000000e+00> : vector<64x64xf32>
    %32 = tpu.matmul %31, %30, %cst {dimension_numbers = #tpu.dot_dimension_numbers<[1], [0], [0], [1], [0, 0, 1, 1], [], []>} : vector<64x64xf32>, vector<64x64xf32>, vector<64x64xf32> -> vector<64x64xf32>
    %c0_14 = arith.constant 0 : index
    %c0_15 = arith.constant 0 : index
    %33 = vector.load %arg5[%c0_14, %c0_15] : memref<64x1xf32, #tpu.memory_space<vmem>>, vector<64x1xf32>
    %34 = vector.broadcast %33 : vector<64x1xf32> to vector<64x64xf32>
    %35 = arith.addf %32, %34 : vector<64x64xf32>
    %cst_16 = arith.constant 0.000000e+00 : f32
    %36 = vector.broadcast %cst_16 : f32 to vector<64x64xf32>
    %37 = arith.maximumf %35, %36 : vector<64x64xf32>
    %c63_i32_17 = arith.constant 63 : i32
    %38 = tpu.dynamic_rotate %37 by %c63_i32_17 dim 1 : vector<64x64xf32>, i32 -> vector<64x64xf32>
    %c62_i32 = arith.constant 62 : i32
    %39 = tpu.dynamic_rotate %37 by %c62_i32 dim 1 : vector<64x64xf32>, i32 -> vector<64x64xf32>
    %40 = tpu.concatenate %37, %38, %39 in 0 : vector<64x64xf32>, vector<64x64xf32>, vector<64x64xf32> -> vector<192x64xf32>
    %c0_18 = arith.constant 0 : index
    %c0_19 = arith.constant 0 : index
    %41 = vector.load %arg6[%c0_18, %c0_19] : memref<16x576xf32, #tpu.memory_space<vmem>>, vector<16x192xf32>
    %cst_20 = arith.constant dense<0.000000e+00> : vector<16x64xf32>
    %42 = tpu.matmul %41, %40, %cst_20 {dimension_numbers = #tpu.dot_dimension_numbers<[1], [0], [0], [1], [0, 0, 1, 1], [], []>} : vector<16x192xf32>, vector<192x64xf32>, vector<16x64xf32> -> vector<16x64xf32>
    %c56_i32_21 = arith.constant 56 : i32
    %43 = tpu.dynamic_rotate %37 by %c56_i32_21 dim 1 : vector<64x64xf32>, i32 -> vector<64x64xf32>
    %c55_i32_22 = arith.constant 55 : i32
    %44 = tpu.dynamic_rotate %37 by %c55_i32_22 dim 1 : vector<64x64xf32>, i32 -> vector<64x64xf32>
    %c54_i32 = arith.constant 54 : i32
    %45 = tpu.dynamic_rotate %37 by %c54_i32 dim 1 : vector<64x64xf32>, i32 -> vector<64x64xf32>
    %46 = tpu.concatenate %43, %44, %45 in 0 : vector<64x64xf32>, vector<64x64xf32>, vector<64x64xf32> -> vector<192x64xf32>
    %c0_23 = arith.constant 0 : index
    %c192 = arith.constant 192 : index
    %47 = vector.load %arg6[%c0_23, %c192] : memref<16x576xf32, #tpu.memory_space<vmem>>, vector<16x192xf32>
    %cst_24 = arith.constant dense<0.000000e+00> : vector<16x64xf32>
    %48 = tpu.matmul %47, %46, %cst_24 {dimension_numbers = #tpu.dot_dimension_numbers<[1], [0], [0], [1], [0, 0, 1, 1], [], []>} : vector<16x192xf32>, vector<192x64xf32>, vector<16x64xf32> -> vector<16x64xf32>
    %49 = arith.addf %42, %48 : vector<16x64xf32>
    %c48_i32 = arith.constant 48 : i32
    %50 = tpu.dynamic_rotate %37 by %c48_i32 dim 1 : vector<64x64xf32>, i32 -> vector<64x64xf32>
    %c47_i32 = arith.constant 47 : i32
    %51 = tpu.dynamic_rotate %37 by %c47_i32 dim 1 : vector<64x64xf32>, i32 -> vector<64x64xf32>
    %c46_i32 = arith.constant 46 : i32
    %52 = tpu.dynamic_rotate %37 by %c46_i32 dim 1 : vector<64x64xf32>, i32 -> vector<64x64xf32>
    %53 = tpu.concatenate %50, %51, %52 in 0 : vector<64x64xf32>, vector<64x64xf32>, vector<64x64xf32> -> vector<192x64xf32>
    %c0_25 = arith.constant 0 : index
    %c384 = arith.constant 384 : index
    %54 = vector.load %arg6[%c0_25, %c384] : memref<16x576xf32, #tpu.memory_space<vmem>>, vector<16x192xf32>
    %cst_26 = arith.constant dense<0.000000e+00> : vector<16x64xf32>
    %55 = tpu.matmul %54, %53, %cst_26 {dimension_numbers = #tpu.dot_dimension_numbers<[1], [0], [0], [1], [0, 0, 1, 1], [], []>} : vector<16x192xf32>, vector<192x64xf32>, vector<16x64xf32> -> vector<16x64xf32>
    %56 = arith.addf %49, %55 : vector<16x64xf32>
    %c0_27 = arith.constant 0 : index
    %c0_28 = arith.constant 0 : index
    %57 = vector.load %arg7[%c0_27, %c0_28] : memref<16x1xf32, #tpu.memory_space<vmem>>, vector<16x1xf32>
    %58 = vector.broadcast %57 : vector<16x1xf32> to vector<16x64xf32>
    %59 = arith.addf %56, %58 : vector<16x64xf32>
    %c0_29 = arith.constant 0 : index
    %c0_30 = arith.constant 0 : index
    %c0_31 = arith.constant 0 : index
    %60 = vector.load %arg8[%c0_29, %c0_30, %c0_31] : memref<1x16x64xf32, #tpu.memory_space<vmem>>, vector<1x16x64xf32>
    %61 = vector.shape_cast %60 : vector<1x16x64xf32> to vector<16x64xf32>
    %62 = vector.shape_cast %59 : vector<16x64xf32> to vector<1x16x64xf32>
    tpu.vector_store %arg8[%c0_29, %c0_30, %c0_31], %62 {strides = array<i32>} : memref<1x16x64xf32, #tpu.memory_space<vmem>>, vector<1x16x64xf32>,
    return
  }
  func.func @transform_0(%arg0: i32) -> (i32, i32, i32) {
    %c0_i32 = arith.constant 0 : i32
    %c0_i32_0 = arith.constant 0 : i32
    %c0_i32_1 = arith.constant 0 : i32
    return %arg0, %c0_i32, %c0_i32_0 : i32, i32, i32
  }
  func.func @transform_1(%arg0: i32) -> (i32, i32) {
    %c0_i32 = arith.constant 0 : i32
    %c0_i32_0 = arith.constant 0 : i32
    %c0_i32_1 = arith.constant 0 : i32
    return %c0_i32, %c0_i32_0 : i32, i32
  }
  func.func @transform_2(%arg0: i32) -> (i32, i32) {
    %c0_i32 = arith.constant 0 : i32
    %c0_i32_0 = arith.constant 0 : i32
    %c0_i32_1 = arith.constant 0 : i32
    return %c0_i32, %c0_i32_0 : i32, i32
  }
  func.func @transform_3(%arg0: i32) -> (i32, i32) {
    %c0_i32 = arith.constant 0 : i32
    %c0_i32_0 = arith.constant 0 : i32
    %c0_i32_1 = arith.constant 0 : i32
    return %c0_i32, %c0_i32_0 : i32, i32
  }
  func.func @transform_4(%arg0: i32) -> (i32, i32) {
    %c0_i32 = arith.constant 0 : i32
    %c0_i32_0 = arith.constant 0 : i32
    %c0_i32_1 = arith.constant 0 : i32
    return %c0_i32, %c0_i32_0 : i32, i32
  }
  func.func @transform_5(%arg0: i32) -> (i32, i32) {
    %c0_i32 = arith.constant 0 : i32
    %c0_i32_0 = arith.constant 0 : i32
    %c0_i32_1 = arith.constant 0 : i32
    return %c0_i32, %c0_i32_0 : i32, i32
  }
  func.func @transform_6(%arg0: i32) -> (i32, i32) {
    %c0_i32 = arith.constant 0 : i32
    %c0_i32_0 = arith.constant 0 : i32
    %c0_i32_1 = arith.constant 0 : i32
    return %c0_i32, %c0_i32_0 : i32, i32
  }
  func.func @transform_7(%arg0: i32) -> (i32, i32, i32) {
    %c0_i32 = arith.constant 0 : i32
    %c0_i32_0 = arith.constant 0 : i32
    %c0_i32_1 = arith.constant 0 : i32
    return %arg0, %c0_i32, %c0_i32_0 : i32, i32, i32
  }
}

</mosaic_0001>

<bundles_post_ra>
// kernel: _lambda_.1
= control target key start
LH: loop header
LB: loop body
LE: loop exit
PB: predicated region body
PF: predicated region fallthrough
CT: control target
= control target key end

     0   :  { %12 = vsyncpa [#allocation3], 0  ;;  %s1767_s24 = smov 0   ;;  %s2146_s0 = inlined_call_operand.vmem [shape: f32[2,1,64], index: 0, kind: input, shape index: {}]   ;;  %s2147_s1 = inlined_call_operand.vmem [shape: f32[16,4], index: 1, kind: input, shape index: {}]   ;;  %s2148_s2 = inlined_call_operand.vmem [shape: f32[16,1], index: 2, kind: input, shape index: {}]   ;;  %s2149_s3 = inlined_call_operand.hbm [shape: f32[64,64], index: 3, kind: input, shape index: {}]   ;;  %s2150_s4 = inlined_call_operand.vmem [shape: f32[64,1], index: 4, kind: input, shape index: {}]   ;;  %s2151_s5 = inlined_call_operand.vmem [shape: f32[16,576], index: 5, kind: input, shape index: {}]   ;;  %s2152_s6 = inlined_call_operand.vmem [shape: f32[16,1], index: 6, kind: input, shape index: {}]   ;;  %s2153_s7 = inlined_call_operand.vmem [shape: f32[2,16,64], index: 7, kind: output, shape index: {}]  }
   0x1 LB: > { %s1773_s25 = sadd.s32 4294967295, %s1711_s24   ;;  %p1217_p0 = scmp.ge.s32.totalorder %s1711_s24, 1  ;;  %s1711_s24 = sphi %s1767_s24, %s18_s24  }
   0x2   : > { %p201_p1 = scmp.lt.s32.totalorder %s1711_s24, 3  ;;  %s1713_s26 = smov [#allocation2]  }
   0x3   : > { %s219_s27 = sshll.u32 %s1713_s26, 4  ;;  %p2154_p3 = scmp.eq.s32.totalorder %s1773_s25, 0  ;;  %s220_s27 = int_to_ptr.vmem [resolvable:$true] %s219_s27 }
   0x4   : > { %p1777_p2 = pnand %p1217_p0, %p201_p1  ;;  %s1673_s9 = scalar_lea.hbm %s2149_s3, 1024 }
   0x5   : > { %p1674_p6 = scmp.ne.s32.totalorder %s2149_s3, %s1673_s9  ;;  %p1680_p10 = scmp.lt.u32.totalorder %s1673_s9, %s2149_s3 }
   0x6   : > { %s2156_s28 = scalar_select %p1777_p2, 1, 0 }
   0x7   : > { %p1413_p4 = pneg %p1777_p2 }
   0x9   : > { %p1786_p5 = pnand %p2154_p3, %p1413_p4 }
   0xb   : > { %p1675_p7 = pneg %p1786_p5 }
   0xd   : > { %p1676_p8 = pnand %p1675_p7, %p1674_p6 }
   0xf   : > { %p1677_p9 = pneg %p1676_p8 }
  0x11   : > { %p1682_p11 = pnand %p1680_p10, %p1677_p9 }
  0x13   : > { %1685 = shalt.err (!%p1682_p11)
}
  0x14   : > { %s1686_s14 = scalar_lea.vmem %s220_s27, 1024  ;;  %p1694_p1 = scmp.lt.s32.totalorder %s220_s27, %s220_s27 }
  0x15   : > { %p1687_p12 = scmp.ne.s32.totalorder %s220_s27, %s1686_s14  ;;  %p1695_p4 = scmp.lt.s32.totalorder %s1686_s14, %s1686_s14 }
  0x17   : > { %p1689_p13 = pnand %p1687_p12, %p1675_p7  ;;  %p1696_p3 = por %p1695_p4, %p1694_p1 }
  0x19   : > { %p1690_p0 = pneg %p1689_p13 }
  0x1b   : > { %p1697_p2 = pnand %p1696_p3, %p1690_p0 }
  0x1d   : > { %1700 = shalt.err (!%p1697_p2)
}
  0x1e   : > { %s1714_s15 = smov 128   ;;  %s1715_s16 = smov 8  }
  0x1f   : > { %1416 = dma.hbm_to_vmem [thread:$0]  (!%p1786_p5), %s2149_s3, 1024, %s220_s27, [#allocation3], %s1714_s15, %s1714_s15, %s1715_s16  }
  0x20   : > { %p2158_p6 = scmp.ne.s32.totalorder %s2156_s28, 0 }
  0x21   : > { %p2159_p8 = scmp.eq.s32.totalorder (!%p2158_p6), %s1773_s25, 0 }
  0x22   : > { %250 = sbr.rel (%p2158_p6) target bundleno = 1782 (0x6f6), region = 48 }
  0x29   : > { %1706 = dma.done.wait (%p2159_p8), [#allocation3], 1024   ;;  %p2160_p7 = pmov %p2159_p8 }
  0x2a   : > { %p280_p2 = scmp.lt.s32.totalorder %s1773_s25, 1  ;;  %v1716_v0 = vmov 1   ;;  %v290_v2 = vld [vmem:[%s2147_s1 + $0x8] sm:$0xff]  ;;  %s1717_s26 = smov 64   ;;  %v289_v3 = vld [vmem:[%s2147_s1] sm:$0xff]  ;;  %v1718_v4 = vmov 2   ;;  %v302_v11 = vlaneseq }
  0x2b   : > { %1708 = vsyncadd (%p2160_p7), [#allocation3], 4294966272  ;;  %1442 = vset.pattern.permute.xlu1 %v1716_v0  ;;  %1441 = vset.pattern.permute.xlu0 %v1716_v0  ;;  %v1719_v5 = vmov 3   ;;  %v1720_v6 = vmov 0   ;;  %v381_v7 = vld [vmem:[%s2148_s2 + $0x8] sm:$0xff]  ;;  %vm309_vm0 = vcmask 1048064  }
  0x2c   : > { %s2162_s25 = smov (!%p280_p2, %s1773_s25), 1  ;;  %321 = vperm.xlu1 %1442, %v290_v2   ;;  %v380_v10 = vld [vmem:[%s2148_s2] sm:$0xff]  ;;  %v303_v14 = vshrl.u32 %v302_v11, 7  ;;  %s1721_s10 = smov 127   ;;  %v426_v0 = vld [vmem:[#allocation2] sm:$0xff]  ;;  %vm482_vm1 = vcmask 523264  }
  0x2d   : > { %s282_s21 = scalar_lea.vmem %s2146_s0, %s2162_s25  ;;  %s1722_s11 = smov 120   ;;  %1273 = vmatprep.mubr.msk.f32.mxu0 %vm482_vm1, %v426_v0 }
  0x2e   : > { %v288_v1 = vld [vmem:[%s282_s21] sm:$0x1]  ;;  %v304_v16 = vsub.s32 0, %v303_v14  ;;  %s1723_s12 = smov 119   ;;  %s1725_s9 = smov 126  }
  0x2f   : > { %310 = vrot.lane.b32.xlu0 %v288_v1, %s1717_s26  ;;  %s1240_s15 = sshll.u32 %s2162_s25, 4 }
  0x30   : > { %1443 = vset.pattern.permute.xlu1 %v1718_v4  ;;  %v305_v34 = vrot.slane %v288_v1, %v304_v16  ;;  %v438_v4 = vld [vmem:[%s2150_s4 + $0x20] sm:$0xff]  ;;  %s287_s17 = scalar_lea.vmem %s2153_s7, %s1240_s15 }
  0x31   : > { %341 = vperm.xlu1 %1443, %v289_v3  }
  0x33   : > { %317 = vperm.xlu0 %1441, %v289_v3  }
  0x35   : > { %345 = vperm.xlu1 %1443, %v290_v2  }
  0x37   : > { %1445 = vset.pattern.permute.xlu0 %v1719_v5 }
  0x39   : > { %1444 = vset.pattern.permute.xlu1 %v1719_v5  ;;  %v437_v5 = vld [vmem:[%s2150_s4 + $0x18] sm:$0xff] }
  0x3a   : > { %361 = vperm.xlu1 %1444, %v289_v3  }
  0x3e   : > { %1446 = vset.pattern.permute.xlu1 %v1720_v6 }
  0x3f   : > { %293 = vperm.xlu1 %1446, %v289_v3   ;;  %v435_v3 = vld [vmem:[%s2150_s4 + $0x8] sm:$0xff] }
  0x43   : > { %298 = vperm.xlu1 %1446, %v290_v2  }
  0x47   : > { %389 = vperm.xlu1 %1446, %v381_v7   ;;  %v439_v7 = vld [vmem:[%s2150_s4 + $0x28] sm:$0xff] }
  0xa1   : > { %v311_v8 = vpop.permute.xlu0 %310 }
  0xa2   : > { %v312_v9 = vsel %vm309_vm0, %v311_v8, %v288_v1  ;;  %v441_v8 = vld [vmem:[%s2150_s4 + $0x38] sm:$0xff] }
  0xa3   : > { %313 = vrot.lane.b32.xlu0 %v312_v9, %s1717_s26 }
  0xa7   : > { %365 = vperm.xlu0 %1445, %v290_v2   ;;  %v436_v2 = vld [vmem:[%s2150_s4 + $0x10] sm:$0xff] }
  0xab   : > { %1447 = vset.pattern.permute.xlu0 %v1720_v6  ;;  %v322_v12 = vpop.permute.xlu1 %321  ;;  %v440_v6 = vld [vmem:[%s2150_s4 + $0x30] sm:$0xff] }
  0xac   : > { %384 = vperm.xlu0 %1447, %v380_v10  }
  0xb0   : > { %v342_v15 = vpop.permute.xlu1 %341 }
  0xb2   : > { %v318_v13 = vpop.permute.xlu0 %317 }
  0xb4   : > { %v346_v20 = vpop.permute.xlu1 %345 }
  0xb9   : > { %v362_v25 = vpop.permute.xlu1 %361 }
  0xbe   : > { %v294_v29 = vpop.permute.xlu1 %293 }
  0xbf   : > { %v307_v37 = vmul.f32 %v305_v34, %v294_v29 }
  0xc2   : > { %v299_v30 = vpop.permute.xlu1 %298 }
  0xc3   : > { %v308_v38 = vmul.f32 %v305_v34, %v299_v30 }
  0xc6   : > { %v390_v31 = vpop.permute.xlu1 %389 }
 0x115   : > { %v314_v17 = vpop.permute.xlu0 %313 }
 0x116   : > { %v315_v18 = vsel %vm309_vm0, %v314_v17, %v288_v1  ;;  %v434_v1 = vld [vmem:[%s2150_s4] sm:$0xff] }
 0x117   : > { %v327_v19 = vrot.slane %v315_v18, %v304_v16 }
 0x119   : > { %v329_v21 = vmul.f32 %v327_v19, %v322_v12  ;;  %v328_v22 = vmul.f32 %v327_v19, %v318_v13  ;;  %v349_v23 = vmul.f32 %v346_v20, %v327_v19  ;;  %v348_v24 = vmul.f32 %v342_v15, %v327_v19 }
 0x11a   : > { %v368_v26 = vmul.f32 %v362_v25, %v327_v19  ;;  %v431_v25 = vld [vmem:[#allocation2 + $0x28] sm:$0xff] }
 0x11b   : > { %334 = vrot.lane.b32.xlu0 %v329_v21, %s1721_s10  ;;  %332 = vrot.lane.b32.xlu1 %v328_v22, %s1721_s10  ;;  %v427_v21 = vld [vmem:[#allocation2 + $0x8] sm:$0xff]  ;;  %v428_v22 = vld [vmem:[#allocation2 + $0x10] sm:$0xff] }
 0x11f   : > { %354 = vrot.lane.b32.xlu0 %v349_v23, %s1722_s11  ;;  %352 = vrot.lane.b32.xlu1 %v348_v24, %s1722_s11  ;;  %v429_v23 = vld [vmem:[#allocation2 + $0x18] sm:$0xff]  ;;  %v430_v24 = vld [vmem:[#allocation2 + $0x20] sm:$0xff] }
 0x123   : > { %372 = vrot.lane.b32.xlu1 %v368_v26, %s1723_s12  ;;  %v432_v26 = vld [vmem:[#allocation2 + $0x30] sm:$0xff] }
 0x126   : > { %v366_v27 = vpop.permute.xlu0 %365 }
 0x127   : > { %v369_v28 = vmul.f32 %v366_v27, %v327_v19  ;;  %v433_v27 = vld [vmem:[#allocation2 + $0x38] sm:$0xff] }
 0x129   : > { %374 = vrot.lane.b32.xlu0 %v369_v28, %s1723_s12  ;;  %v1724_v28 = vmov 0.0|0.0  }
 0x12a   : > { %1301 = vmatprep.subr.bf16.mxu1 %v1724_v28 }
 0x12b   : > { %v385_v32 = vpop.permute.xlu0 %384 }
 0x18d   : > { %v333_v33 = vpop.permute.xlu1 %332  ;;  %v335_v35 = vpop.permute.xlu0 %334 }
 0x18e   : > { %v338_v39 = vadd.f32 %v333_v33, %v307_v37  ;;  %v339_v42 = vadd.f32 %v335_v35, %v308_v38 }
 0x191   : > { %v353_v36 = vpop.permute.xlu1 %352  ;;  %v355_v40 = vpop.permute.xlu0 %354 }
 0x192   : > { %v358_v43 = vadd.f32 %v353_v36, %v338_v39  ;;  %v359_v44 = vadd.f32 %v355_v40, %v339_v42 }
 0x195   : > { %v373_v41 = vpop.permute.xlu1 %372 }
 0x196   : > { %v378_v45 = vadd.f32 %v373_v41, %v358_v43 }
 0x198   : > { %v392_v48 = vadd.f32 %v385_v32, %v378_v45 }
 0x19b   : > { %v375_v46 = vpop.permute.xlu0 %374 }
 0x19c   : > { %v379_v47 = vadd.f32 %v375_v46, %v359_v44 }
 0x19e   : > { %v393_v49 = vadd.f32 %v390_v31, %v379_v47 }
 0x1a0   : > { %v1448_v50 = vpack.i.bf16 %v393_v49, %v392_v48  ;;  %v1285_v51 = vpack.c.bf16 %v393_v49, %v392_v48 }
 0x1a2   : > { %1449 = vrot.lane.b32.xlu1 %v1448_v50, %s1717_s26  ;;  %1286 = vmatprep.subr.bf16.mxu0 %v1285_v51 }
 0x1a3   : > { %1288 = vmatpush3.bf16.msra.mxu0 %v1285_v51 }
 0x214   : > { %v1450_v52 = vpop.permute.xlu1 %1449 }
 0x215   : > { %v1452_v53 = vunpack.i.h.bf16 %v1450_v52  ;;  %v1451_v54 = vunpack.i.l.bf16 %v1450_v52 }
 0x217   : > { %v396_v55 = vsel %vm309_vm0, %v1451_v54, %v392_v48  ;;  %v399_v56 = vsel %vm309_vm0, %v1452_v53, %v393_v49 }
 0x218   : > { %v1453_v57 = vpack.i.bf16 %v399_v56, %v396_v55 }
 0x21a   : > { %1454 = vrot.lane.b32.xlu0 %v1453_v57, %s1717_s26 }
 0x28c   : > { %v1455_v58 = vpop.permute.xlu0 %1454 }
 0x28d   : > { %v1457_v59 = vunpack.i.h.bf16 %v1455_v58  ;;  %v1456_v60 = vunpack.i.l.bf16 %v1455_v58 }
 0x28f   : > { %v404_v61 = vsel %vm309_vm0, %v1456_v60, %v392_v48  ;;  %v405_v62 = vsel %vm309_vm0, %v1457_v59, %v393_v49 }
 0x290   : > { %v1463_v63 = vpack.i.bf16 %v405_v62, %v404_v61 }
 0x292   : > { %1464 = vrot.lane.b32.xlu0 %v1463_v63, %s1722_s11  ;;  %1459 = vrot.lane.b32.xlu1 %v1463_v63, %s1721_s10 }
 0x296   : > { %444 = vperm.xlu0 %1447, %v434_v1   ;;  %1469 = vrot.lane.b32.xlu1 %v1463_v63, %s1723_s12 }
 0x29a   : > { %454 = vperm.xlu0 %1447, %v436_v2   ;;  %449 = vperm.xlu1 %1446, %v435_v3  }
 0x29e   : > { %464 = vperm.xlu0 %1447, %v438_v4   ;;  %459 = vperm.xlu1 %1446, %v437_v5  }
 0x2a2   : > { %474 = vperm.xlu0 %1447, %v440_v6   ;;  %469 = vperm.xlu1 %1446, %v439_v7  }
 0x2a6   : > { %479 = vperm.xlu1 %1446, %v441_v8  }
 0x304   : > { %v1465_v9 = vpop.permute.xlu0 %1464  ;;  %v1460_v10 = vpop.permute.xlu1 %1459 }
 0x305   : > { %v1467_v11 = vunpack.i.h.bf16 %v1465_v9  ;;  %v1466_v12 = vunpack.i.l.bf16 %v1465_v9  ;;  %v1462_v13 = vunpack.i.h.bf16 %v1460_v10  ;;  %v1461_v14 = vunpack.i.l.bf16 %v1460_v10 }
 0x307   : > { %v1289_v15 = vpack.c.bf16 %v1462_v13, %v1461_v14  ;;  %v1293_v17 = vpack.c.bf16 %v1467_v11, %v1466_v12 }
 0x308   : > { %v1470_v16 = vpop.permute.xlu1 %1469 }
 0x309   : > { %v1472_v18 = vunpack.i.h.bf16 %v1470_v16  ;;  %v1471_v19 = vunpack.i.l.bf16 %v1470_v16  ;;  %1290 = vmatprep.subr.bf16.mxu0 %v1289_v15 }
 0x30a   : > { %1292 = vmatpush3.bf16.msra.mxu0 %v1289_v15 }
 0x30b   : > { %1294 = vmatprep.subr.bf16.mxu0 %v1293_v17  ;;  %v1297_v20 = vpack.c.bf16 %v1472_v18, %v1471_v19 }
 0x30e   : > { %1296 = vmatpush3.bf16.msra.mxu0 %v1293_v17 }
 0x30f   : > { %1298 = vmatprep.subr.bf16.mxu0 %v1297_v20 }
 0x312   : > { %1300 = vmatpush3.bf16.msra.mxu0 %v1297_v20 }
 0x313   : > { %1337 = vmatprep.subr.bf16.mxu0 %v1724_v28 }
 0x315   : > { %1274 = vmatmul.mubr.msk.f32.vlgmr.msra.gmra.mrb[0].mxu0 %vm482_vm1, %v427_v21  ;;  %v445_v30 = vpop.permute.xlu0 %444 }
 0x316   : > { %1276 = vmatprep.mubr.msk.f32.mxu0 %vm482_vm1, %v428_v22 }
 0x319   : > { %1277 = vmatmul.mubr.msk.f32.gmra.mrb[2].mxu0 %vm482_vm1, %v429_v23  ;;  %v450_v29 = vpop.permute.xlu1 %449  ;;  %v455_v33 = vpop.permute.xlu0 %454 }
 0x31a   : > { %1279 = vmatprep.mubr.msk.f32.mxu0 %vm482_vm1, %v430_v24 }
 0x31d   : > { %1280 = vmatmul.mubr.msk.f32.gmra.mrb[4].mxu0 %vm482_vm1, %v431_v25  ;;  %v460_v31 = vpop.permute.xlu1 %459  ;;  %v465_v46 = vpop.permute.xlu0 %464 }
 0x31e   : > { %1282 = vmatprep.mubr.msk.f32.mxu0 %vm482_vm1, %v432_v26 }
 0x321   : > { %1283 = vmatmul.mubr.msk.f32.gmra.mrb[6].mxu0 %vm482_vm1, %v433_v27  ;;  %v470_v42 = vpop.permute.xlu1 %469  ;;  %v475_v59 = vpop.permute.xlu0 %474 }
 0x325   : > { %v480_v56 = vpop.permute.xlu1 %479 }
 0x3e8   : > { %v1275_v32 = vpop.f32.mrb[0].mxu0 }
 0x3e9   : > { %v579_v34 = vadd.f32 %v1275_v32, %v450_v29  ;;  %v573_v35 = vpop.f32.mrb[1].mxu0 }
 0x3ea   : > { %v574_v36 = vadd.f32 %v573_v35, %v445_v30 }
 0x3eb   : > { %v1885_v37 = vmax.f32 %v579_v34, 0.0 }
 0x3ec   : > { %v1887_v38 = vmax.f32 %v574_v36, 0.0  ;;  %v1278_v39 = vpop.f32.mrb[2].mxu0 }
 0x3ed   : > { %v589_v40 = vadd.f32 %v1278_v39, %v460_v31  ;;  %v583_v41 = vpop.f32.mrb[3].mxu0 }
 0x3ee   : > { %v584_v43 = vadd.f32 %v583_v41, %v455_v33  ;;  %v1473_v44 = vpack.i.bf16 %v1885_v37, %v1887_v38  ;;  %v1338_v45 = vpack.c.bf16 %v1885_v37, %v1887_v38 }
 0x3ef   : > { %v1893_v47 = vmax.f32 %v589_v40, 0.0 }
 0x3f0   : > { %v1895_v48 = vmax.f32 %v584_v43, 0.0  ;;  %v1281_v49 = vpop.f32.mrb[4].mxu0  ;;  %1474 = vrot.lane.b32.xlu0 %v1473_v44, %s1717_s26  ;;  %1339 = vmatpush1.bf16.msra.mxu0 %v1338_v45 }
 0x3f1   : > { %v599_v50 = vadd.f32 %v1281_v49, %v470_v42  ;;  %v593_v51 = vpop.f32.mrb[5].mxu0  ;;  %1340 = vmatprep.subr.bf16.mxu0 %v1724_v28 }
 0x3f2   : > { %v594_v52 = vadd.f32 %v593_v51, %v465_v46  ;;  %v1478_v53 = vpack.i.bf16 %v1893_v47, %v1895_v48  ;;  %v1341_v54 = vpack.c.bf16 %v1893_v47, %v1895_v48 }
 0x3f3   : > { %v1903_v55 = vmax.f32 %v599_v50, 0.0 }
 0x3f4   : > { %v1905_v57 = vmax.f32 %v594_v52, 0.0  ;;  %v1284_v58 = vpop.f32.mrb[6].mxu0  ;;  %1479 = vrot.lane.b32.xlu1 %v1478_v53, %s1717_s26  ;;  %1342 = vmatpush1.bf16.msra.mxu0 %v1341_v54  ;;  %v1983_v54 = vld [vmem:[%s2151_s5 + $0x8] sm:$0xff] }
 0x3f5   : > { %v609_v60 = vadd.f32 %v1284_v58, %v480_v56  ;;  %v603_v61 = vpop.f32.mrb[7].mxu0  ;;  %1343 = vmatprep.subr.bf16.mxu0 %v1724_v28  ;;  %1234 = vmatprep.mubr.msk.f32.mxu0 %vm482_vm1, %v1983_v54 }
 0x3f6   : > { %v604_v62 = vadd.f32 %v603_v61, %v475_v59  ;;  %v1483_v63 = vpack.i.bf16 %v1903_v55, %v1905_v57  ;;  %v1344_v0 = vpack.c.bf16 %v1903_v55, %v1905_v57 }
 0x3f7   : > { %v1913_v1 = vmax.f32 %v609_v60, 0.0 }
 0x3f8   : > { %v1915_v2 = vmax.f32 %v604_v62, 0.0  ;;  %1484 = vrot.lane.b32.xlu0 %v1483_v63, %s1717_s26  ;;  %1345 = vmatpush1.bf16.msra.mxu0 %v1344_v0 }
 0x3f9   : > { %1346 = vmatprep.subr.bf16.mxu0 %v1724_v28 }
 0x3fa   : > { %v1488_v3 = vpack.i.bf16 %v1913_v1, %v1915_v2  ;;  %v1347_v4 = vpack.c.bf16 %v1913_v1, %v1915_v2 }
 0x3fc   : > { %1489 = vrot.lane.b32.xlu1 %v1488_v3, %s1717_s26  ;;  %1348 = vmatpush1.bf16.msra.mxu0 %v1347_v4 }
 0x3fd   : > { %1349 = vmatprep.subr.bf16.mxu0 %v1724_v28 }
 0x462   : > { %v1475_v5 = vpop.permute.xlu0 %1474 }
 0x463   : > { %v1477_v6 = vunpack.i.h.bf16 %v1475_v5  ;;  %v1476_v7 = vunpack.i.l.bf16 %v1475_v5 }
 0x465   : > { %v622_v8 = vsel %vm309_vm0, %v1476_v7, %v1887_v38  ;;  %v625_v9 = vsel %vm309_vm0, %v1477_v6, %v1885_v37 }
 0x466   : > { %v1480_v10 = vpop.permute.xlu1 %1479  ;;  %v1493_v11 = vpack.i.bf16 %v625_v9, %v622_v8 }
 0x467   : > { %v1482_v12 = vunpack.i.h.bf16 %v1480_v10  ;;  %v1481_v13 = vunpack.i.l.bf16 %v1480_v10 }
 0x468   : > { %1494 = vrot.lane.b32.xlu0 %v1493_v11, %s1717_s26 }
 0x469   : > { %v628_v14 = vsel %vm309_vm0, %v1481_v13, %v1895_v48  ;;  %v631_v15 = vsel %vm309_vm0, %v1482_v12, %v1893_v47 }
 0x46a   : > { %v1485_v16 = vpop.permute.xlu0 %1484  ;;  %v1498_v17 = vpack.i.bf16 %v631_v15, %v628_v14 }
 0x46b   : > { %v1487_v18 = vunpack.i.h.bf16 %v1485_v16  ;;  %v1486_v19 = vunpack.i.l.bf16 %v1485_v16 }
 0x46c   : > { %1499 = vrot.lane.b32.xlu1 %v1498_v17, %s1717_s26 }
 0x46d   : > { %v634_v20 = vsel %vm309_vm0, %v1486_v19, %v1905_v57  ;;  %v637_v21 = vsel %vm309_vm0, %v1487_v18, %v1903_v55 }
 0x46e   : > { %v1490_v22 = vpop.permute.xlu1 %1489  ;;  %v1503_v23 = vpack.i.bf16 %v637_v21, %v634_v20 }
 0x46f   : > { %v1492_v24 = vunpack.i.h.bf16 %v1490_v22  ;;  %v1491_v25 = vunpack.i.l.bf16 %v1490_v22 }
 0x470   : > { %1504 = vrot.lane.b32.xlu0 %v1503_v23, %s1717_s26 }
 0x471   : > { %v640_v26 = vsel %vm309_vm0, %v1491_v25, %v1915_v2  ;;  %v643_v27 = vsel %vm309_vm0, %v1492_v24, %v1913_v1 }
 0x472   : > { %v1508_v29 = vpack.i.bf16 %v643_v27, %v640_v26 }
 0x474   : > { %1509 = vrot.lane.b32.xlu1 %v1508_v29, %s1717_s26 }
 0x4da   : > { %v1495_v30 = vpop.permute.xlu0 %1494 }
 0x4db   : > { %v1497_v31 = vunpack.i.h.bf16 %v1495_v30  ;;  %v1496_v32 = vunpack.i.l.bf16 %v1495_v30 }
 0x4dd   : > { %v661_v33 = vsel %vm309_vm0, %v1497_v31, %v1885_v37  ;;  %v660_v34 = vsel %vm309_vm0, %v1496_v32, %v1887_v38 }
 0x4de   : > { %v1500_v35 = vpop.permute.xlu1 %1499  ;;  %v1949_v36 = vpack.i.bf16 %v661_v33, %v660_v34  ;;  %v728_v33 = vld [vmem:[%s2151_s5 + $0x10] sm:$0xff] }
 0x4df   : > { %v1502_v39 = vunpack.i.h.bf16 %v1500_v35  ;;  %v1501_v40 = vunpack.i.l.bf16 %v1500_v35 }
 0x4e0   : > { %1514 = vrot.lane.b32.xlu0 %v1949_v36, %s1721_s10 }
 0x4e1   : > { %v663_v41 = vsel %vm309_vm0, %v1502_v39, %v1893_v47  ;;  %v662_v42 = vsel %vm309_vm0, %v1501_v40, %v1895_v48 }
 0x4e2   : > { %v1505_v43 = vpop.permute.xlu0 %1504  ;;  %v1957_v44 = vpack.i.bf16 %v663_v41, %v662_v42 }
 0x4e3   : > { %v1507_v37 = vunpack.i.h.bf16 %v1505_v43  ;;  %v1506_v45 = vunpack.i.l.bf16 %v1505_v43  ;;  %v724_v43 = vld [vmem:[%s2151_s5] sm:$0xff] }
 0x4e4   : > { %1519 = vrot.lane.b32.xlu1 %v1957_v44, %s1721_s10 }
 0x4e5   : > { %v665_v38 = vsel %vm309_vm0, %v1507_v37, %v1903_v55  ;;  %v664_v46 = vsel %vm309_vm0, %v1506_v45, %v1905_v57  ;;  %v729_v37 = vld [vmem:[%s2151_s5 + $0x38] sm:$0xff]  ;;  %v1135_v45 = vld [vmem:[%s2152_s6] sm:$0xff] }
 0x4e6   : > { %v1510_v49 = vpop.permute.xlu1 %1509  ;;  %v1965_v50 = vpack.i.bf16 %v665_v38, %v664_v46  ;;  %v1136_v38 = vld [vmem:[%s2152_s6 + $0x8] sm:$0xff] }
 0x4e7   : > { %v1512_v47 = vunpack.i.h.bf16 %v1510_v49  ;;  %v1511_v51 = vunpack.i.l.bf16 %v1510_v49  ;;  %v726_v46 = vld [vmem:[%s2151_s5 + $0x28] sm:$0xff] }
 0x4e8   : > { %1524 = vrot.lane.b32.xlu0 %v1965_v50, %s1721_s10 }
 0x4e9   : > { %v667_v48 = vsel %vm309_vm0, %v1512_v47, %v1913_v1  ;;  %v666_v52 = vsel %vm309_vm0, %v1511_v51, %v1915_v2 }
 0x4ea   : > { %v1973_v53 = vpack.i.bf16 %v667_v48, %v666_v52 }
 0x4ec   : > { %1529 = vrot.lane.b32.xlu1 %v1973_v53, %s1721_s10  ;;  %1534 = vrot.lane.b32.xlu0 %v1949_v36, %s1725_s9  ;;  %s1726_s10 = smov 112  }
 0x4f0   : > { %1539 = vrot.lane.b32.xlu1 %v1957_v44, %s1725_s9  ;;  %1544 = vrot.lane.b32.xlu0 %v1965_v50, %s1725_s9 }
 0x4f4   : > { %1549 = vrot.lane.b32.xlu1 %v1973_v53, %s1725_s9  ;;  %1554 = vrot.lane.b32.xlu0 %v1949_v36, %s1722_s11 }
 0x4f8   : > { %1559 = vrot.lane.b32.xlu1 %v1957_v44, %s1722_s11  ;;  %1564 = vrot.lane.b32.xlu0 %v1965_v50, %s1722_s11 }
 0x4fc   : > { %1569 = vrot.lane.b32.xlu1 %v1973_v53, %s1722_s11 }
 0x552   : > { %v1996_v55 = vpop.permute.xlu0 %1514 }
 0x553   : > { %v1517_v56 = vunpack.i.h.bf16 %v1996_v55  ;;  %v1516_v57 = vunpack.i.l.bf16 %v1996_v55  ;;  %1574 = vrot.lane.b32.xlu0 %v1996_v55, %s1722_s11 }
 0x555   : > { %v1350_v58 = vpack.c.bf16 %v1517_v56, %v1516_v57 }
 0x556   : > { %v2000_v59 = vpop.permute.xlu1 %1519 }
 0x557   : > { %v1522_v60 = vunpack.i.h.bf16 %v2000_v59  ;;  %v1521_v61 = vunpack.i.l.bf16 %v2000_v59  ;;  %1351 = vmatpush1.bf16.msra.mxu0 %v1350_v58  ;;  %1579 = vrot.lane.b32.xlu1 %v2000_v59, %s1722_s11 }
 0x558   : > { %1352 = vmatprep.subr.bf16.mxu0 %v1724_v28 }
 0x559   : > { %v1353_v62 = vpack.c.bf16 %v1522_v60, %v1521_v61 }
 0x55a   : > { %v2007_v63 = vpop.permute.xlu0 %1524 }
 0x55b   : > { %v1527_v0 = vunpack.i.h.bf16 %v2007_v63  ;;  %v1526_v1 = vunpack.i.l.bf16 %v2007_v63  ;;  %1354 = vmatpush1.bf16.msra.mxu0 %v1353_v62  ;;  %1584 = vrot.lane.b32.xlu0 %v2007_v63, %s1722_s11 }
 0x55c   : > { %1355 = vmatprep.subr.bf16.mxu0 %v1724_v28 }
 0x55d   : > { %v1356_v2 = vpack.c.bf16 %v1527_v0, %v1526_v1 }
 0x55e   : > { %v2014_v3 = vpop.permute.xlu1 %1529  ;;  %v2016_v4 = vpop.permute.xlu0 %1534 }
 0x55f   : > { %v1532_v5 = vunpack.i.h.bf16 %v2014_v3  ;;  %v1531_v6 = vunpack.i.l.bf16 %v2014_v3  ;;  %v1537_v7 = vunpack.i.h.bf16 %v2016_v4  ;;  %v1536_v8 = vunpack.i.l.bf16 %v2016_v4  ;;  %1357 = vmatpush1.bf16.msra.mxu0 %v1356_v2  ;;  %1589 = vrot.lane.b32.xlu1 %v2014_v3, %s1722_s11 }
 0x560   : > { %1358 = vmatprep.subr.bf16.mxu0 %v1724_v28  ;;  %1594 = vrot.lane.b32.xlu0 %v2016_v4, %s1722_s11 }
 0x561   : > { %v1359_v9 = vpack.c.bf16 %v1532_v5, %v1531_v6  ;;  %v1362_v16 = vpack.c.bf16 %v1537_v7, %v1536_v8 }
 0x562   : > { %v2025_v10 = vpop.permute.xlu1 %1539  ;;  %v2027_v11 = vpop.permute.xlu0 %1544 }
 0x563   : > { %v1542_v12 = vunpack.i.h.bf16 %v2025_v10  ;;  %v1541_v13 = vunpack.i.l.bf16 %v2025_v10  ;;  %v1547_v14 = vunpack.i.h.bf16 %v2027_v11  ;;  %v1546_v15 = vunpack.i.l.bf16 %v2027_v11  ;;  %1360 = vmatpush1.bf16.msra.mxu0 %v1359_v9  ;;  %1599 = vrot.lane.b32.xlu1 %v2025_v10, %s1722_s11 }
 0x564   : > { %1361 = vmatprep.subr.bf16.mxu0 %v1724_v28  ;;  %1604 = vrot.lane.b32.xlu0 %v2027_v11, %s1722_s11 }
 0x565   : > { %v1365_v24 = vpack.c.bf16 %v1542_v12, %v1541_v13  ;;  %v1368_v34 = vpack.c.bf16 %v1547_v14, %v1546_v15 }
 0x566   : > { %v1550_v17 = vpop.permute.xlu1 %1549  ;;  %v1555_v18 = vpop.permute.xlu0 %1554 }
 0x567   : > { %v1552_v19 = vunpack.i.h.bf16 %v1550_v17  ;;  %v1551_v20 = vunpack.i.l.bf16 %v1550_v17  ;;  %v1557_v21 = vunpack.i.h.bf16 %v1555_v18  ;;  %v1556_v22 = vunpack.i.l.bf16 %v1555_v18  ;;  %1363 = vmatpush1.bf16.msra.mxu0 %v1362_v16  ;;  %1614 = vrot.lane.b32.xlu1 %v1550_v17, %s1722_s11 }
 0x568   : > { %1364 = vmatprep.subr.bf16.mxu0 %v1724_v28  ;;  %1609 = vrot.lane.b32.xlu0 %v1949_v36, %s1726_s10 }
 0x569   : > { %v1302_v23 = vpack.c.bf16 %v1557_v21, %v1556_v22  ;;  %v1371_v41 = vpack.c.bf16 %v1552_v19, %v1551_v20 }
 0x56a   : > { %v1560_v25 = vpop.permute.xlu1 %1559  ;;  %v1565_v26 = vpop.permute.xlu0 %1564 }
 0x56b   : > { %v1562_v27 = vunpack.i.h.bf16 %v1560_v25  ;;  %v1561_v29 = vunpack.i.l.bf16 %v1560_v25  ;;  %1303 = vmatpush1.bf16.msra.mxu1 %v1302_v23  ;;  %1366 = vmatpush1.bf16.msra.mxu0 %v1365_v24  ;;  %v1567_v31 = vunpack.i.h.bf16 %v1565_v26  ;;  %v1566_v32 = vunpack.i.l.bf16 %v1565_v26 }
 0x56c   : > { %1304 = vmatprep.subr.bf16.mxu1 %v1724_v28  ;;  %1367 = vmatprep.subr.bf16.mxu0 %v1724_v28 }
 0x56d   : > { %v1305_v30 = vpack.c.bf16 %v1562_v27, %v1561_v29  ;;  %734 = vrot.lane.b32.xlu1 %v1983_v54, %s1717_s26  ;;  %736 = vrot.lane.b32.xlu0 %v728_v33, %s1717_s26  ;;  %v1308_v36 = vpack.c.bf16 %v1567_v31, %v1566_v32 }
 0x56e   : > { %v1570_v35 = vpop.permute.xlu1 %1569 }
 0x56f   : > { %1306 = vmatpush1.bf16.msra.mxu1 %v1305_v30  ;;  %1369 = vmatpush1.bf16.msra.mxu0 %v1368_v34  ;;  %v1572_v39 = vunpack.i.h.bf16 %v1570_v35  ;;  %v1571_v40 = vunpack.i.l.bf16 %v1570_v35 }
 0x570   : > { %1307 = vmatprep.subr.bf16.mxu1 %v1724_v28  ;;  %1370 = vmatprep.subr.bf16.mxu0 %v1724_v28 }
 0x571   : > { %1619 = vrot.lane.b32.xlu1 %v1957_v44, %s1726_s10  ;;  %1624 = vrot.lane.b32.xlu0 %v1965_v50, %s1726_s10  ;;  %v1311_v42 = vpack.c.bf16 %v1572_v39, %v1571_v40  ;;  %v727_v44 = vld [vmem:[%s2151_s5 + $0x30] sm:$0xff] }
 0x573   : > { %1309 = vmatpush1.bf16.msra.mxu1 %v1308_v36  ;;  %1372 = vmatpush1.bf16.msra.mxu0 %v1371_v41 }
 0x574   : > { %1310 = vmatprep.subr.bf16.mxu1 %v1724_v28 }
 0x575   : > { %1629 = vrot.lane.b32.xlu1 %v1973_v53, %s1726_s10  ;;  %1634 = vrot.lane.b32.xlu0 %v1996_v55, %s1726_s10 }
 0x576   : > { %966 = vmatmul.mubr.f32.vlgmr.msra.gmra.mrb[8].mxu0 %v724_v43 }
 0x577   : > { %1312 = vmatpush1.bf16.msra.mxu1 %v1311_v42  ;;  %1235 = vmatprep.mubr.msk.f32.mxu0 %vm482_vm1, %v727_v44 }
 0x578   : > { %1313 = vmatprep.subr.bf16.mxu1 %v1724_v28 }
 0x579   : > { %1639 = vrot.lane.b32.xlu1 %v2000_v59, %s1726_s10  ;;  %1644 = vrot.lane.b32.xlu0 %v2007_v63, %s1726_s10 }
 0x57a   : > { %971 = vmatmul.mubr.f32.gmra.mrb[10].mxu0 %v726_v46  ;;  %v977_v46 = vld [vmem:[%s2151_s5 + $0x20] sm:$0xff] }
 0x57d   : > { %1649 = vrot.lane.b32.xlu1 %v2014_v3, %s1726_s10  ;;  %1654 = vrot.lane.b32.xlu0 %v2016_v4, %s1726_s10 }
 0x581   : > { %1659 = vrot.lane.b32.xlu1 %v2025_v10, %s1726_s10  ;;  %1664 = vrot.lane.b32.xlu0 %v2027_v11, %s1726_s10 }
 0x585   : > { %738 = vrot.lane.b32.xlu1 %v727_v44, %s1717_s26  ;;  %740 = vrot.lane.b32.xlu0 %v729_v37, %s1717_s26 }
 0x589   : > { %1669 = vrot.lane.b32.xlu1 %v1550_v17, %s1726_s10  ;;  %1139 = vperm.xlu0 %1447, %v1135_v45  }
 0x58d   : > { %1144 = vperm.xlu1 %1446, %v1136_v38  }
 0x5c5   : > { %v1575_v49 = vpop.permute.xlu0 %1574 }
 0x5c6   : > { %v1577_v50 = vunpack.i.h.bf16 %v1575_v49  ;;  %v1576_v47 = vunpack.i.l.bf16 %v1575_v49 }
 0x5c8   : > { %v1314_v51 = vpack.c.bf16 %v1577_v50, %v1576_v47 }
 0x5c9   : > { %v1580_v48 = vpop.permute.xlu1 %1579 }
 0x5ca   : > { %v1582_v52 = vunpack.i.h.bf16 %v1580_v48  ;;  %v1581_v53 = vunpack.i.l.bf16 %v1580_v48  ;;  %1315 = vmatpush1.bf16.msra.mxu1 %v1314_v51 }
 0x5cb   : > { %1316 = vmatprep.subr.bf16.mxu1 %v1724_v28 }
 0x5cc   : > { %v1317_v54 = vpack.c.bf16 %v1582_v52, %v1581_v53 }
 0x5cd   : > { %v1585_v55 = vpop.permute.xlu0 %1584 }
 0x5ce   : > { %v1587_v56 = vunpack.i.h.bf16 %v1585_v55  ;;  %v1586_v57 = vunpack.i.l.bf16 %v1585_v55  ;;  %1318 = vmatpush1.bf16.msra.mxu1 %v1317_v54 }
 0x5cf   : > { %1319 = vmatprep.subr.bf16.mxu1 %v1724_v28 }
 0x5d0   : > { %v1320_v58 = vpack.c.bf16 %v1587_v56, %v1586_v57 }
 0x5d1   : > { %v1590_v59 = vpop.permute.xlu1 %1589 }
 0x5d2   : > { %v1595_v60 = vpop.permute.xlu0 %1594  ;;  %v1592_v61 = vunpack.i.h.bf16 %v1590_v59  ;;  %v1591_v62 = vunpack.i.l.bf16 %v1590_v59  ;;  %1321 = vmatpush1.bf16.msra.mxu1 %v1320_v58 }
 0x5d3   : > { %1322 = vmatprep.subr.bf16.mxu1 %v1724_v28  ;;  %v1597_v0 = vunpack.i.h.bf16 %v1595_v60  ;;  %v1596_v1 = vunpack.i.l.bf16 %v1595_v60 }
 0x5d4   : > { %v1323_v63 = vpack.c.bf16 %v1592_v61, %v1591_v62 }
 0x5d5   : > { %v1600_v2 = vpop.permute.xlu1 %1599  ;;  %v1326_v4 = vpack.c.bf16 %v1597_v0, %v1596_v1 }
 0x5d6   : > { %v1605_v3 = vpop.permute.xlu0 %1604  ;;  %1324 = vmatpush1.bf16.msra.mxu1 %v1323_v63  ;;  %v1602_v5 = vunpack.i.h.bf16 %v1600_v2  ;;  %v1601_v6 = vunpack.i.l.bf16 %v1600_v2 }
 0x5d7   : > { %1325 = vmatprep.subr.bf16.mxu1 %v1724_v28  ;;  %v1607_v10 = vunpack.i.h.bf16 %v1605_v3  ;;  %v1606_v11 = vunpack.i.l.bf16 %v1605_v3 }
 0x5d8   : > { %v1329_v9 = vpack.c.bf16 %v1602_v5, %v1601_v6 }
 0x5d9   : > { %v1615_v7 = vpop.permute.xlu1 %1614  ;;  %v1332_v14 = vpack.c.bf16 %v1607_v10, %v1606_v11 }
 0x5da   : > { %v1610_v8 = vpop.permute.xlu0 %1609  ;;  %1327 = vmatpush1.bf16.msra.mxu1 %v1326_v4  ;;  %v1617_v15 = vunpack.i.h.bf16 %v1615_v7  ;;  %v1616_v16 = vunpack.i.l.bf16 %v1615_v7  ;;  %v976_v7 = vld [vmem:[%s2151_s5 + $0x18] sm:$0xff] }
 0x5db   : > { %1328 = vmatprep.subr.bf16.mxu1 %v1724_v28  ;;  %v1612_v20 = vunpack.i.h.bf16 %v1610_v8  ;;  %v1611_v21 = vunpack.i.l.bf16 %v1610_v8  ;;  %v979_v8 = vld [vmem:[%s2151_s5 + $0x48] sm:$0xff] }
 0x5dc   : > { %v1335_v19 = vpack.c.bf16 %v1617_v15, %v1616_v16 }
 0x5dd   : > { %v1374_v24 = vpack.c.bf16 %v1612_v20, %v1611_v21 }
 0x5de   : > { %1330 = vmatpush1.bf16.msra.mxu1 %v1329_v9  ;;  %v978_v9 = vld [vmem:[%s2151_s5 + $0x40] sm:$0xff] }
 0x5df   : > { %v735_v12 = vpop.permute.xlu1 %734  ;;  %v737_v13 = vpop.permute.xlu0 %736  ;;  %1331 = vmatprep.subr.bf16.mxu1 %v1724_v28 }
 0x5e0   : > { %1232 = vmatprep.mubr.msk.f32.mxu1 %vm482_vm1, %v737_v13  ;;  %v742_v27 = vsel %vm482_vm1, %v735_v12, %v737_v13 }
 0x5e2   : > { %1333 = vmatpush1.bf16.msra.mxu1 %v1332_v14 }
 0x5e3   : > { %v1620_v17 = vpop.permute.xlu1 %1619  ;;  %v1625_v18 = vpop.permute.xlu0 %1624  ;;  %1334 = vmatprep.subr.bf16.mxu1 %v1724_v28 }
 0x5e4   : > { %v1622_v25 = vunpack.i.h.bf16 %v1620_v17  ;;  %v1621_v26 = vunpack.i.l.bf16 %v1620_v17  ;;  %v1627_v32 = vunpack.i.h.bf16 %v1625_v18  ;;  %v1626_v33 = vunpack.i.l.bf16 %v1625_v18 }
 0x5e6   : > { %1336 = vmatpush1.bf16.msra.mxu1 %v1335_v19  ;;  %v1377_v31 = vpack.c.bf16 %v1622_v25, %v1621_v26  ;;  %v1380_v36 = vpack.c.bf16 %v1627_v32, %v1626_v33 }
 0x5e7   : > { %v1630_v22 = vpop.permute.xlu1 %1629  ;;  %v1635_v23 = vpop.permute.xlu0 %1634  ;;  %1373 = vmatprep.subr.bf16.mxu1 %v1724_v28 }
 0x5e8   : > { %v1632_v39 = vunpack.i.h.bf16 %v1630_v22  ;;  %v1631_v40 = vunpack.i.l.bf16 %v1630_v22  ;;  %v1637_v44 = vunpack.i.h.bf16 %v1635_v23  ;;  %v1636_v37 = vunpack.i.l.bf16 %v1635_v23 }
 0x5e9   : > { %887 = vmatmul.mubr.f32.vlgmr.msra.gmra.mrb[0].mxu1 %v742_v27 }
 0x5ea   : > { %1375 = vmatpush1.bf16.msra.mxu1 %v1374_v24  ;;  %v1383_v43 = vpack.c.bf16 %v1632_v39, %v1631_v40  ;;  %v1386_v50 = vpack.c.bf16 %v1637_v44, %v1636_v37 }
 0x5eb   : > { %v1640_v29 = vpop.permute.xlu1 %1639  ;;  %v1645_v30 = vpop.permute.xlu0 %1644  ;;  %1376 = vmatprep.subr.bf16.mxu1 %v1724_v28 }
 0x5ec   : > { %v1642_v47 = vunpack.i.h.bf16 %v1640_v29  ;;  %v1641_v51 = vunpack.i.l.bf16 %v1640_v29  ;;  %v1647_v52 = vunpack.i.h.bf16 %v1645_v30  ;;  %v1646_v53 = vunpack.i.l.bf16 %v1645_v30 }
 0x5ee   : > { %1378 = vmatpush1.bf16.msra.mxu1 %v1377_v31  ;;  %v1389_v48 = vpack.c.bf16 %v1642_v47, %v1641_v51  ;;  %v1392_v54 = vpack.c.bf16 %v1647_v52, %v1646_v53 }
 0x5ef   : > { %v1650_v34 = vpop.permute.xlu1 %1649  ;;  %v1655_v35 = vpop.permute.xlu0 %1654  ;;  %1379 = vmatprep.subr.bf16.mxu1 %v1724_v28 }
 0x5f0   : > { %v1652_v55 = vunpack.i.h.bf16 %v1650_v34  ;;  %v1651_v56 = vunpack.i.l.bf16 %v1650_v34  ;;  %v1657_v58 = vunpack.i.h.bf16 %v1655_v35  ;;  %v1656_v59 = vunpack.i.l.bf16 %v1655_v35 }
 0x5f2   : > { %1381 = vmatpush1.bf16.msra.mxu1 %v1380_v36  ;;  %v1395_v57 = vpack.c.bf16 %v1652_v55, %v1651_v56  ;;  %v1398_v60 = vpack.c.bf16 %v1657_v58, %v1656_v59 }
 0x5f3   : > { %v1660_v41 = vpop.permute.xlu1 %1659  ;;  %v1665_v42 = vpop.permute.xlu0 %1664  ;;  %1382 = vmatprep.subr.bf16.mxu1 %v1724_v28 }
 0x5f4   : > { %v1662_v61 = vunpack.i.h.bf16 %v1660_v41  ;;  %v1661_v62 = vunpack.i.l.bf16 %v1660_v41  ;;  %v1667_v0 = vunpack.i.h.bf16 %v1665_v42  ;;  %v1666_v1 = vunpack.i.l.bf16 %v1665_v42 }
 0x5f6   : > { %1384 = vmatpush1.bf16.msra.mxu1 %v1383_v43  ;;  %v1401_v63 = vpack.c.bf16 %v1662_v61, %v1661_v62  ;;  %v1404_v3 = vpack.c.bf16 %v1667_v0, %v1666_v1 }
 0x5f7   : > { %v739_v45 = vpop.permute.xlu1 %738  ;;  %v741_v38 = vpop.permute.xlu0 %740  ;;  %1385 = vmatprep.subr.bf16.mxu1 %v1724_v28 }
 0x5f8   : > { %1233 = vmatprep.mubr.msk.f32.mxu1 %vm482_vm1, %v741_v38  ;;  %v743_v49 = vsel %vm482_vm1, %v739_v45, %v741_v38 }
 0x5f9   : > { %892 = vmatmul.mubr.f32.gmra.mrb[2].mxu1 %v743_v49 }
 0x5fa   : > { %1236 = vmatprep.mubr.msk.f32.mxu1 %vm482_vm1, %v977_v46  ;;  %1387 = vmatpush1.bf16.msra.mxu1 %v1386_v50 }
 0x5fb   : > { %1388 = vmatprep.subr.bf16.mxu1 %v1724_v28  ;;  %v1670_v2 = vpop.permute.xlu1 %1669 }
 0x5fc   : > { %v1672_v4 = vunpack.i.h.bf16 %v1670_v2  ;;  %v1671_v5 = vunpack.i.l.bf16 %v1670_v2 }
 0x5fe   : > { %1390 = vmatpush1.bf16.msra.mxu1 %v1389_v48  ;;  %v1407_v6 = vpack.c.bf16 %v1672_v4, %v1671_v5 }
 0x5ff   : > { %1391 = vmatprep.subr.bf16.mxu1 %v1724_v28 }
 0x602   : > { %1393 = vmatpush1.bf16.msra.mxu1 %v1392_v54 }
 0x603   : > { %1394 = vmatprep.subr.bf16.mxu1 %v1724_v28 }
 0x606   : > { %1396 = vmatpush1.bf16.msra.mxu1 %v1395_v57 }
 0x607   : > { %1397 = vmatprep.subr.bf16.mxu1 %v1724_v28 }
 0x608   : > { %v1140_v22 = vpop.permute.xlu0 %1139 }
 0x60a   : > { %1399 = vmatpush1.bf16.msra.mxu1 %v1398_v60 }
 0x60b   : > { %1400 = vmatprep.subr.bf16.mxu1 %v1724_v28 }
 0x60c   : > { %v1145_v27 = vpop.permute.xlu1 %1144 }
 0x60e   : > { %1402 = vmatpush1.bf16.msra.mxu1 %v1401_v63 }
 0x60f   : > { %1403 = vmatprep.subr.bf16.mxu1 %v1724_v28 }
 0x612   : > { %1405 = vmatpush1.bf16.msra.mxu1 %v1404_v3 }
 0x613   : > { %1406 = vmatprep.subr.bf16.mxu1 %v1724_v28 }
 0x616   : > { %1408 = vmatpush1.bf16.msra.mxu1 %v1407_v6 }
 0x619   : > { %1123 = vmatmul.mubr.f32.vlgmr.msra.gmra.mrb[4].mxu1 %v976_v7 }
 0x61a   : > { %1237 = vmatprep.mubr.msk.f32.mxu1 %vm482_vm1, %v979_v8 }
 0x61d   : > { %1128 = vmatmul.mubr.f32.gmra.mrb[6].mxu1 %v978_v9 }
 0x649   : > { %v967_v28 = vpop.f32.mrb[8].mxu0 }
 0x64a   : > { %v969_v10 = vpop.f32.mrb[9].mxu0 }
 0x64d   : > { %v972_v11 = vpop.f32.mrb[10].mxu0 }
 0x64e   : > { %v974_v12 = vpop.f32.mrb[11].mxu0 }
 0x6bc   : > { %v888_v13 = vpop.f32.mrb[0].mxu1 }
 0x6bd   : > { %v968_v14 = vadd.f32 %v967_v28, %v888_v13  ;;  %v890_v15 = vpop.f32.mrb[1].mxu1 }
 0x6cc   : > { %v893_v16 = vpop.f32.mrb[2].mxu1 }
 0x6cd   : > { %v895_v17 = vpop.f32.mrb[3].mxu1  ;;  %v973_v18 = vadd.f32 %v972_v11, %v893_v16 }
 0x6ec   : > { %v1124_v19 = vpop.f32.mrb[4].mxu1 }
 0x6ed   : > { %v1133_v20 = vadd.f32 %v1124_v19, %v968_v14  ;;  %v1126_v21 = vpop.f32.mrb[5].mxu1 }
 0x6ef   : > { %v1147_v23 = vadd.f32 %v1140_v22, %v1133_v20 }
 0x6f0   : > { %v1129_v24 = vpop.f32.mrb[6].mxu1 }
 0x6f1   : > { %1149 = vst.msk [vmem:[%s287_s17] sm:$0xff] %vm482_vm1, %v1147_v23  ;;  %v1134_v25 = vadd.f32 %v1129_v24, %v973_v18  ;;  %v1131_v26 = vpop.f32.mrb[7].mxu1 }
 0x6f3   : > { %v1148_v29 = vadd.f32 %v1145_v27, %v1134_v25 }
 0x6f5   : > { %1150 = vst.msk [vmem:[%s287_s17 + $0x8] sm:$0xff] %vm482_vm1, %v1148_v29 }
 0x6f6 PF: > { %s18_s24 = sadd.s32 1, %s1711_s24  }
 0x6f7   : > { %p15_p3 = scmp.ge.s32.totalorder %s18_s24, 4  }
 0x6f9   :  { %17 = sbr.rel (!%p15_p3) target bundleno = 1 (0x1), region = 83 }
 0x700   :  { %1172 = vsyncpa [#allocation3], 1 }
 0x701   :  { %1174 = vsyncpa [#allocation3 + $0x1], 1 }

</bundles_post_ra>
